<compile_context>
chip_gen: v7x
topology: tpu7x:2x2x1
jax: 0.10.0
libtpu: 0.0.40
codegen_flags: <defaults>
</compile_context>

<pallas_src>
import functools
import math

import jax
import jax.numpy as jnp
from jax.experimental import pallas as pl
from jax.experimental.pallas import tpu as pltpu


def _round_up(x: int, m: int) -> int:
    return ((x + m - 1) // m) * m


def _fixed_embedding_table(c_in: int, d_model: int) -> jnp.ndarray:
    """Same construction as FixedEmbedding.__init__ in the PyTorch module."""
    position = jnp.arange(c_in, dtype=jnp.float32)[:, None]
    div_term = jnp.exp(
        jnp.arange(0, d_model, 2, dtype=jnp.float32) * -(math.log(10000.0) / d_model)
    )
    angles = position * div_term
    w = jnp.zeros((c_in, d_model), dtype=jnp.float32)
    w = w.at[:, 0::2].set(jnp.sin(angles))
    w = w.at[:, 1::2].set(jnp.cos(angles)[:, : (d_model // 2)])
    return w


_SIZES = {"month": 13, "day": 32, "weekday": 7, "hour": 24, "minute": 4}


@functools.lru_cache(maxsize=None)
def _build_tables(d_model: int, freq: str):
    """Per-feature tables, the x columns they read, row offsets, and the fused f32 table."""
    order = ["month", "day", "weekday", "hour"]
    cols = (0, 1, 2, 3)
    if freq == "t":
        order = order + ["minute"]
        cols = cols + (4,)
    tables = [_fixed_embedding_table(_SIZES[name], d_model) for name in order]
    offsets, acc = [], 0
    for t in tables:
        offsets.append(acc)
        acc += t.shape[0]
    k0 = _round_up(acc, 128)                 # one-hot block width = a full 128-lane vreg
    fused = jnp.zeros((k0, d_model), jnp.float32)
    for off, t in zip(offsets, tables):
        fused = fused.at[off:off + t.shape[0]].set(t)
    return fused, cols, tuple(offsets), tuple(tables)


@functools.lru_cache(maxsize=None)
def _prepared_tables(d_model: int, freq: str, G: int, d_pad: int, precision: str):
    """Block-diagonal (kron) embedding table(s) in the matmul dtype, cached per config."""
    fused, cols, offsets, _ = _build_tables(d_model, freq)
    k0 = fused.shape[0]
    if d_pad != d_model:                      # lane-dense padding for d_model not dividing 128
        fused = jnp.pad(fused, ((0, 0), (0, d_pad - d_model)))
    big = jnp.kron(jnp.eye(G, dtype=jnp.float32), fused) if G > 1 else fused  # (G*k0, G*d_pad)
    if precision == "float32":
        tables = (big,)
    elif precision == "bf16":
        tables = (big.astype(jnp.bfloat16),)
    else:  # "bf16_hilo" (default): exact one-hot x (hi + lo) -> ~f32 accuracy on a bf16 MXU
        hi = big.astype(jnp.bfloat16)
        lo = (big - hi.astype(jnp.float32)).astype(jnp.bfloat16)
        tables = (hi, lo)
    return tables, cols, offsets, k0


def _embed_kernel(ids_ref, *table_and_out_refs, G: int, T: int, K0: int):
    """One tile: per-group-slot 128-wide one-hot blocks -> lane-aligned concat -> wide matmul."""
    out_ref = table_and_out_refs[-1]
    table_refs = table_and_out_refs[:-1]
    cdt = table_refs[0].dtype

    ids = ids_ref[...]                                   # (tm, G*T) int32, row offsets only
    tm = ids.shape[0]
    iota = jax.lax.broadcasted_iota(jnp.int32, (tm, K0), 1)

    blocks = []
    for p in range(G):                                   # compares are (tm, K0), not (tm, G*K0)
        base = p * T
        hit = ids[:, base:base + 1] == iota
        for j in range(1, T):                            # per-block hits are disjoint -> OR
            hit = jnp.logical_or(hit, ids[:, base + j:base + j + 1] == iota)
        blocks.append(hit.astype(cdt))                   # 0/1 exact in bf16
    onehot = blocks[0] if G == 1 else jnp.concatenate(blocks, axis=1)   # (tm, G*K0)

    acc = jnp.dot(onehot, table_refs[0][...], preferred_element_type=jnp.float32)
    for t_ref in table_refs[1:]:                         # hi/lo split: second bf16 matmul
        acc = acc + jnp.dot(onehot, t_ref[...], preferred_element_type=jnp.float32)
    out_ref[...] = acc.astype(out_ref.dtype)


def temporal_embedding(x, d_model: int = 32, freq: str = "h", *,
                       tokens_per_tile: int = 16384,
                       precision: str = "bf16_hilo",
                       out_dtype=jnp.float32):
    """Pallas equivalent of TemporalEmbedding.forward (embed_type='fixed')."""
    B, L, F = x.shape
    N = B * L

    # Lane-dense output geometry: pack G tokens per 128-wide row, or pad columns to 128*k.
    if d_model <= 128 and 128 % d_model == 0:
        G, d_pad = 128 // d_model, d_model
    else:
        G, d_pad = 1, _round_up(d_model, 128)
    out_w = G * d_pad                                    # always a multiple of 128

    tables, cols, offsets, K0 = _prepared_tables(d_model, freq, G, d_pad, precision)
    T = len(cols)
    K = tables[0].shape[0]                               # G * K0

    # Wrapper-side index prep: select used feature columns, add per-table row offsets.
    idx = x.reshape(N, F).astype(jnp.int32)
    ids = jnp.take(idx, jnp.asarray(cols, jnp.int32), axis=1) \
        + jnp.asarray(offsets, jnp.int32)[None, :]       # (N, T)

    # Fold G tokens per output row (padded tokens hit fused row 0 and are sliced off below).
    n_g_raw = pl.cdiv(N, G)
    if n_g_raw * G != N:
        ids = jnp.pad(ids, ((0, n_g_raw * G - N), (0, 0)))
    ids = ids.reshape(n_g_raw, G * T)

    # Tile rows: >= 2 balanced grid steps when there is enough work (v7x has two TensorCores),
    # chosen to minimize padded rows; a single step for tiny inputs.
    tm_max = max(8, tokens_per_tile // G)
    steps = max(2, pl.cdiv(n_g_raw, tm_max)) if n_g_raw >= 16 else 1
    tm = _round_up(pl.cdiv(n_g_raw, steps), 8)
    n_g = steps * tm
    if n_g != n_g_raw:
        ids = jnp.pad(ids, ((0, n_g - n_g_raw), (0, 0)))

    kernel = functools.partial(_embed_kernel, G=G, T=T, K0=K0)
    table_specs = [pl.BlockSpec((K, out_w), lambda i: (0, 0)) for _ in tables]

    out2d = pl.pallas_call(
        kernel,
        out_shape=jax.ShapeDtypeStruct((n_g, out_w), out_dtype),
        grid_spec=pltpu.PrefetchScalarGridSpec(
            num_scalar_prefetch=0,
            grid=(steps,),
            in_specs=[pl.BlockSpec((tm, G * T), lambda i: (i, 0))] + table_specs,
            out_specs=pl.BlockSpec((tm, out_w), lambda i: (i, 0)),
        ),
        compiler_params=pltpu.CompilerParams(
            dimension_semantics=("parallel",),           # shard tiles across TCs (v7x)
            vmem_limit_bytes=32 * 1024 * 1024,
        ),
    )(ids, *tables)

    out = out2d.reshape(n_g * G, d_pad)[:N, :d_model]
    return out.reshape(B, L, d_model)


def _reference(x, d_model: int, freq: str):
    """Pure-JAX reference: plain gathers + sum (mirrors the PyTorch forward)."""
    _, cols, _, tables = _build_tables(d_model, freq)
    out = 0.0
    for col, table in zip(cols, tables):
        out = out + jnp.take(table, x[:, :, col], axis=0)
    return out


if __name__ == "__main__":
    key = jax.random.PRNGKey(0)
    B, L, d_model = 2, 8, 32
    k_mon, k_day, k_wd, k_hr, k_min = jax.random.split(key, 5)

    month = jax.random.randint(k_mon, (B, L, 1), 0, 13, dtype=jnp.int32)
    day = jax.random.randint(k_day, (B, L, 1), 0, 32, dtype=jnp.int32)
    weekday = jax.random.randint(k_wd, (B, L, 1), 0, 7, dtype=jnp.int32)
    hour = jax.random.randint(k_hr, (B, L, 1), 0, 24, dtype=jnp.int32)
    minute = jax.random.randint(k_min, (B, L, 1), 0, 4, dtype=jnp.int32)
    x = jnp.concatenate([month, day, weekday, hour, minute], axis=-1)  # (B, L, 5)

    # Default precision: bf16 hi/lo split on the MXU (~4e-6 error on O(1) sinusoids).
    out = jax.block_until_ready(temporal_embedding(x, d_model=d_model, freq="h"))
    ref = _reference(x, d_model=d_model, freq="h")
    assert out.shape == (B, L, d_model)
    assert jnp.allclose(out, ref, atol=1e-4, rtol=1e-4), float(jnp.max(jnp.abs(out - ref)))

    # Minute-table path (freq == 't').
    out_t = jax.block_until_ready(temporal_embedding(x, d_model=d_model, freq="t"))
    ref_t = _reference(x, d_model=d_model, freq="t")
    assert jnp.allclose(out_t, ref_t, atol=1e-4, rtol=1e-4)

    # Exact-f32 MXU path still available when bit-tight accuracy is required.
    out_f32 = jax.block_until_ready(
        temporal_embedding(x, d_model=d_model, freq="h", precision="float32"))
    assert jnp.allclose(out_f32, ref, atol=1e-5, rtol=1e-5)

    print("KERNEL_OK")
</pallas_src>

<mosaic_0001>
module attributes {stable_mosaic.version = 11 : i64} {
  func.func @_embed_kernel(%arg0: i32, %arg1: memref<8x16xi32, #tpu.memory_space<vmem>>, %arg2: memref<512x128xbf16, #tpu.memory_space<vmem>>, %arg3: memref<512x128xbf16, #tpu.memory_space<vmem>>, %arg4: memref<8x128xf32, #tpu.memory_space<vmem>>) attributes {dimension_semantics = [#tpu.dimension_semantics<parallel>], iteration_bounds = array<i64: 1>, scalar_prefetch = 0 : i64, scratch_operands = 0 : i64, tpu.core_type = #tpu.core_type<tc>, window_params = [{transform_indices = @transform_0, window_bounds = array<i64: 8, 16>}, {pipeline_mode = #tpu.pipeline_mode<synchronous>, transform_indices = @transform_1, window_bounds = array<i64: 512, 128>}, {pipeline_mode = #tpu.pipeline_mode<synchronous>, transform_indices = @transform_2, window_bounds = array<i64: 512, 128>}, {transform_indices = @transform_3, window_bounds = array<i64: 8, 128>}]} {
    %c0 = arith.constant 0 : index
    %c0_0 = arith.constant 0 : index
    %0 = vector.load %arg1[%c0, %c0_0] : memref<8x16xi32, #tpu.memory_space<vmem>>, vector<8x16xi32>
    %1 = tpu.iota {dimensions = array<i32: 1>} : vector<8x128xi32>
    %2 = vector.extract_strided_slice %0 {offsets = [0, 0], sizes = [8, 1], strides = [1, 1]} : vector<8x16xi32> to vector<8x1xi32>
    %3 = vector.broadcast %2 : vector<8x1xi32> to vector<8x128xi32>
    %4 = arith.cmpi eq, %3, %1 : vector<8x128xi32>
    %5 = vector.extract_strided_slice %0 {offsets = [0, 1], sizes = [8, 1], strides = [1, 1]} : vector<8x16xi32> to vector<8x1xi32>
    %6 = vector.broadcast %5 : vector<8x1xi32> to vector<8x128xi32>
    %7 = arith.cmpi eq, %6, %1 : vector<8x128xi32>
    %8 = arith.ori %4, %7 : vector<8x128xi1>
    %9 = vector.extract_strided_slice %0 {offsets = [0, 2], sizes = [8, 1], strides = [1, 1]} : vector<8x16xi32> to vector<8x1xi32>
    %10 = vector.broadcast %9 : vector<8x1xi32> to vector<8x128xi32>
    %11 = arith.cmpi eq, %10, %1 : vector<8x128xi32>
    %12 = arith.ori %8, %11 : vector<8x128xi1>
    %13 = vector.extract_strided_slice %0 {offsets = [0, 3], sizes = [8, 1], strides = [1, 1]} : vector<8x16xi32> to vector<8x1xi32>
    %14 = vector.broadcast %13 : vector<8x1xi32> to vector<8x128xi32>
    %15 = arith.cmpi eq, %14, %1 : vector<8x128xi32>
    %16 = arith.ori %12, %15 : vector<8x128xi1>
    %17 = arith.extui %16 : vector<8x128xi1> to vector<8x128xi32>
    %18 = arith.sitofp %17 : vector<8x128xi32> to vector<8x128xf32>
    %19 = arith.truncf %18 : vector<8x128xf32> to vector<8x128xbf16>
    %20 = vector.extract_strided_slice %0 {offsets = [0, 4], sizes = [8, 1], strides = [1, 1]} : vector<8x16xi32> to vector<8x1xi32>
    %21 = vector.broadcast %20 : vector<8x1xi32> to vector<8x128xi32>
    %22 = arith.cmpi eq, %21, %1 : vector<8x128xi32>
    %23 = vector.extract_strided_slice %0 {offsets = [0, 5], sizes = [8, 1], strides = [1, 1]} : vector<8x16xi32> to vector<8x1xi32>
    %24 = vector.broadcast %23 : vector<8x1xi32> to vector<8x128xi32>
    %25 = arith.cmpi eq, %24, %1 : vector<8x128xi32>
    %26 = arith.ori %22, %25 : vector<8x128xi1>
    %27 = vector.extract_strided_slice %0 {offsets = [0, 6], sizes = [8, 1], strides = [1, 1]} : vector<8x16xi32> to vector<8x1xi32>
    %28 = vector.broadcast %27 : vector<8x1xi32> to vector<8x128xi32>
    %29 = arith.cmpi eq, %28, %1 : vector<8x128xi32>
    %30 = arith.ori %26, %29 : vector<8x128xi1>
    %31 = vector.extract_strided_slice %0 {offsets = [0, 7], sizes = [8, 1], strides = [1, 1]} : vector<8x16xi32> to vector<8x1xi32>
    %32 = vector.broadcast %31 : vector<8x1xi32> to vector<8x128xi32>
    %33 = arith.cmpi eq, %32, %1 : vector<8x128xi32>
    %34 = arith.ori %30, %33 : vector<8x128xi1>
    %35 = arith.extui %34 : vector<8x128xi1> to vector<8x128xi32>
    %36 = arith.sitofp %35 : vector<8x128xi32> to vector<8x128xf32>
    %37 = arith.truncf %36 : vector<8x128xf32> to vector<8x128xbf16>
    %38 = vector.extract_strided_slice %0 {offsets = [0, 8], sizes = [8, 1], strides = [1, 1]} : vector<8x16xi32> to vector<8x1xi32>
    %39 = vector.broadcast %38 : vector<8x1xi32> to vector<8x128xi32>
    %40 = arith.cmpi eq, %39, %1 : vector<8x128xi32>
    %41 = vector.extract_strided_slice %0 {offsets = [0, 9], sizes = [8, 1], strides = [1, 1]} : vector<8x16xi32> to vector<8x1xi32>
    %42 = vector.broadcast %41 : vector<8x1xi32> to vector<8x128xi32>
    %43 = arith.cmpi eq, %42, %1 : vector<8x128xi32>
    %44 = arith.ori %40, %43 : vector<8x128xi1>
    %45 = vector.extract_strided_slice %0 {offsets = [0, 10], sizes = [8, 1], strides = [1, 1]} : vector<8x16xi32> to vector<8x1xi32>
    %46 = vector.broadcast %45 : vector<8x1xi32> to vector<8x128xi32>
    %47 = arith.cmpi eq, %46, %1 : vector<8x128xi32>
    %48 = arith.ori %44, %47 : vector<8x128xi1>
    %49 = vector.extract_strided_slice %0 {offsets = [0, 11], sizes = [8, 1], strides = [1, 1]} : vector<8x16xi32> to vector<8x1xi32>
    %50 = vector.broadcast %49 : vector<8x1xi32> to vector<8x128xi32>
    %51 = arith.cmpi eq, %50, %1 : vector<8x128xi32>
    %52 = arith.ori %48, %51 : vector<8x128xi1>
    %53 = arith.extui %52 : vector<8x128xi1> to vector<8x128xi32>
    %54 = arith.sitofp %53 : vector<8x128xi32> to vector<8x128xf32>
    %55 = arith.truncf %54 : vector<8x128xf32> to vector<8x128xbf16>
    %56 = vector.extract_strided_slice %0 {offsets = [0, 12], sizes = [8, 1], strides = [1, 1]} : vector<8x16xi32> to vector<8x1xi32>
    %57 = vector.broadcast %56 : vector<8x1xi32> to vector<8x128xi32>
    %58 = arith.cmpi eq, %57, %1 : vector<8x128xi32>
    %59 = vector.extract_strided_slice %0 {offsets = [0, 13], sizes = [8, 1], strides = [1, 1]} : vector<8x16xi32> to vector<8x1xi32>
    %60 = vector.broadcast %59 : vector<8x1xi32> to vector<8x128xi32>
    %61 = arith.cmpi eq, %60, %1 : vector<8x128xi32>
    %62 = arith.ori %58, %61 : vector<8x128xi1>
    %63 = vector.extract_strided_slice %0 {offsets = [0, 14], sizes = [8, 1], strides = [1, 1]} : vector<8x16xi32> to vector<8x1xi32>
    %64 = vector.broadcast %63 : vector<8x1xi32> to vector<8x128xi32>
    %65 = arith.cmpi eq, %64, %1 : vector<8x128xi32>
    %66 = arith.ori %62, %65 : vector<8x128xi1>
    %67 = vector.extract_strided_slice %0 {offsets = [0, 15], sizes = [8, 1], strides = [1, 1]} : vector<8x16xi32> to vector<8x1xi32>
    %68 = vector.broadcast %67 : vector<8x1xi32> to vector<8x128xi32>
    %69 = arith.cmpi eq, %68, %1 : vector<8x128xi32>
    %70 = arith.ori %66, %69 : vector<8x128xi1>
    %71 = arith.extui %70 : vector<8x128xi1> to vector<8x128xi32>
    %72 = arith.sitofp %71 : vector<8x128xi32> to vector<8x128xf32>
    %73 = arith.truncf %72 : vector<8x128xf32> to vector<8x128xbf16>
    %74 = tpu.concatenate %19, %37, %55, %73 in 1 : vector<8x128xbf16>, vector<8x128xbf16>, vector<8x128xbf16>, vector<8x128xbf16> -> vector<8x512xbf16>
    %c0_1 = arith.constant 0 : index
    %c0_2 = arith.constant 0 : index
    %75 = vector.load %arg2[%c0_1, %c0_2] : memref<512x128xbf16, #tpu.memory_space<vmem>>, vector<512x128xbf16>
    %cst = arith.constant dense<0.000000e+00> : vector<8x128xf32>
    %76 = tpu.matmul %74, %75, %cst {dimension_numbers = #tpu.dot_dimension_numbers<[1], [0], [0], [1], [0, 0, 1, 1], [], []>} : vector<8x512xbf16>, vector<512x128xbf16>, vector<8x128xf32> -> vector<8x128xf32>
    %c0_3 = arith.constant 0 : index
    %c0_4 = arith.constant 0 : index
    %77 = vector.load %arg3[%c0_3, %c0_4] : memref<512x128xbf16, #tpu.memory_space<vmem>>, vector<512x128xbf16>
    %cst_5 = arith.constant dense<0.000000e+00> : vector<8x128xf32>
    %78 = tpu.matmul %74, %77, %cst_5 {dimension_numbers = #tpu.dot_dimension_numbers<[1], [0], [0], [1], [0, 0, 1, 1], [], []>} : vector<8x512xbf16>, vector<512x128xbf16>, vector<8x128xf32> -> vector<8x128xf32>
    %79 = arith.addf %76, %78 : vector<8x128xf32>
    %c0_6 = arith.constant 0 : index
    %c0_7 = arith.constant 0 : index
    %80 = vector.load %arg4[%c0_6, %c0_7] : memref<8x128xf32, #tpu.memory_space<vmem>>, vector<8x128xf32>
    tpu.vector_store %arg4[%c0_6, %c0_7], %79 {strides = array<i32>} : memref<8x128xf32, #tpu.memory_space<vmem>>, vector<8x128xf32>,
    return
  }
  func.func @transform_0(%arg0: i32) -> (i32, i32) {
    %c0_i32 = arith.constant 0 : i32
    %c0_i32_0 = arith.constant 0 : i32
    return %arg0, %c0_i32 : i32, i32
  }
  func.func @transform_1(%arg0: i32) -> (i32, i32) {
    %c0_i32 = arith.constant 0 : i32
    %c0_i32_0 = arith.constant 0 : i32
    %c0_i32_1 = arith.constant 0 : i32
    return %c0_i32, %c0_i32_0 : i32, i32
  }
  func.func @transform_2(%arg0: i32) -> (i32, i32) {
    %c0_i32 = arith.constant 0 : i32
    %c0_i32_0 = arith.constant 0 : i32
    %c0_i32_1 = arith.constant 0 : i32
    return %c0_i32, %c0_i32_0 : i32, i32
  }
  func.func @transform_3(%arg0: i32) -> (i32, i32) {
    %c0_i32 = arith.constant 0 : i32
    %c0_i32_0 = arith.constant 0 : i32
    return %arg0, %c0_i32 : i32, i32
  }
}

</mosaic_0001>

<bundles_post_ra>
// kernel: tpu_custom_call.1
= control target key start
LH: loop header
LB: loop body
LE: loop exit
PB: predicated region body
PF: predicated region fallthrough
CT: control target
= control target key end

     0   :  { %8 = vsyncpa [#allocation3], 0  ;;  %s1413_s0 = inlined_call_operand.hbm [shape: s32[8,16], index: 0, kind: input, shape index: {}]   ;;  %s1414_s1 = inlined_call_operand.hbm [shape: bf16[512,128], index: 1, kind: input, shape index: {}]   ;;  %s1415_s2 = inlined_call_operand.hbm [shape: bf16[512,128], index: 2, kind: input, shape index: {}]   ;;  %s1416_s3 = inlined_call_operand.hbm [shape: f32[8,128], index: 3, kind: output, shape index: {}]  }
   0x1   :  { %9 = vsyncpa [#allocation6], 0 }
   0x2   :  { %10 = vsyncpa [#allocation4], 0  ;;  %s1204_s12 = smov [#allocation5]   ;;  %s1110_s16 = scalar_lea.hbm %s1414_s1, 4096 }
   0x3   :  { %s26_s13 = sshll.u32 %s1204_s12, 4  ;;  %p1111_p0 = scmp.ne.s32.totalorder %s1414_s1, %s1110_s16  ;;  %s27_s13 = int_to_ptr.vmem [resolvable:$true] %s26_s13 }
   0x4   :  { %p1114_p1 = scmp.lt.u32.totalorder %s1110_s16, %s1414_s1 }
   0x6   :  { %p1116_p2 = pnand %p1114_p1, %p1111_p0 }
   0x8   :  { %1119 = shalt.err (!%p1116_p2)
}
   0x9   :  { %s1120_s21 = scalar_lea.vmem %s27_s13, 4096  ;;  %p1125_p4 = scmp.lt.s32.totalorder %s27_s13, %s27_s13 }
   0xa   :  { %p1121_p3 = scmp.ne.s32.totalorder %s27_s13, %s1120_s21  ;;  %p1126_p5 = scmp.lt.s32.totalorder %s1120_s21, %s1120_s21 }
   0xc   :  { %p1127_p6 = por %p1126_p5, %p1125_p4 }
   0xe   :  { %p1128_p7 = pnand %p1127_p6, %p1121_p3 }
  0x10   :  { %1131 = shalt.err (!%p1128_p7)
}
  0x11   :  { %s1205_s22 = smov 64   ;;  %s1206_s23 = smov 4  }
  0x12   :  { %32 = dma.hbm_to_vmem [thread:$0]  %s1414_s1, 4096, %s27_s13, [#allocation6], %s1205_s22, %s1205_s22, %s1206_s23  }
  0x13   :  { %s1207_s26 = smov [#allocation2]   ;;  %s1208_s28 = smov [#allocation7]  }
  0x14   :  { %s17_s27 = sshll.u32 %s1207_s26, 4  ;;  %s38_s29 = sshll.u32 %s1208_s28, 4  ;;  %s18_s27 = int_to_ptr.vmem [resolvable:$true] %s17_s27  ;;  %s39_s29 = int_to_ptr.vmem [resolvable:$true] %s38_s29 }
  0x15   :  { %s1132_s5 = scalar_lea.hbm %s1413_s0, 128 }
  0x16   :  { %p1133_p8 = scmp.ne.s32.totalorder %s1413_s0, %s1132_s5  ;;  %p1136_p9 = scmp.lt.u32.totalorder %s1132_s5, %s1413_s0 }
  0x18   :  { %p1138_p10 = pnand %p1136_p9, %p1133_p8 }
  0x1a   :  { %1141 = shalt.err (!%p1138_p10)
}
  0x1b   :  { %s1142_s1 = scalar_lea.vmem %s18_s27, 128  ;;  %p1147_p12 = scmp.lt.s32.totalorder %s18_s27, %s18_s27 }
  0x1c   :  { %p1143_p11 = scmp.ne.s32.totalorder %s18_s27, %s1142_s1  ;;  %p1148_p13 = scmp.lt.s32.totalorder %s1142_s1, %s1142_s1 }
  0x1e   :  { %p1149_p0 = por %p1148_p13, %p1147_p12 }
  0x20   :  { %p1150_p1 = pnand %p1149_p0, %p1143_p11 }
  0x22   :  { %1153 = shalt.err (!%p1150_p1)
}
  0x23   :  { %20 = dma.hbm_to_vmem [thread:$0]  %s1413_s0, 128, %s18_s27, [#allocation3]  }
  0x24   :  { %s1154_s14 = scalar_lea.hbm %s1415_s2, 4096 }
  0x25   :  { %p1155_p2 = scmp.ne.s32.totalorder %s1415_s2, %s1154_s14  ;;  %p1158_p3 = scmp.lt.u32.totalorder %s1154_s14, %s1415_s2 }
  0x27   :  { %p1160_p4 = pnand %p1158_p3, %p1155_p2 }
  0x29   :  { %1163 = shalt.err (!%p1160_p4)
}
  0x2a   :  { %s1164_s19 = scalar_lea.vmem %s39_s29, 4096  ;;  %p1169_p6 = scmp.lt.s32.totalorder %s39_s29, %s39_s29 }
  0x2b   :  { %p1165_p5 = scmp.ne.s32.totalorder %s39_s29, %s1164_s19  ;;  %p1170_p7 = scmp.lt.s32.totalorder %s1164_s19, %s1164_s19 }
  0x2d   :  { %p1171_p8 = por %p1170_p7, %p1169_p6 }
  0x2f   :  { %p1172_p9 = pnand %p1171_p8, %p1165_p5 }
  0x31   :  { %1175 = shalt.err (!%p1172_p9)
}
  0x32   :  { %44 = dma.hbm_to_vmem [thread:$0]  %s1415_s2, 4096, %s39_s29, [#allocation6], %s1205_s22, %s1205_s22, %s1206_s23  }
  0x33   :  { %1198 = dma.done.wait [#allocation3], 128  }
  0x34   :  { %1199 = vsyncadd [#allocation3], 4294967168 }
  0x35   :  { %1200 = dma.done.wait [#allocation6], 8192  }
  0x36   :  { %1201 = vsyncadd [#allocation6], 4294959104  ;;  %v1209_v0 = vmov 4   ;;  %v1210_v1 = vmov 0   ;;  %v1289_v2 = vld [vmem:[#allocation2] sm:$0xff]  ;;  %v1046_v3 = vld [vmem:[#allocation7 + $0x40] sm:$0xff]   ;;  %v56_v53 = vlaneseq }
  0x37   :  { %1030 = vset.pattern.permute.xlu0 %v1209_v0  ;;  %1032 = vset.pattern.permute.xlu1 %v1210_v1  ;;  %v1047_v4 = vld [vmem:[#allocation7] sm:$0xff]   ;;  %v1048_v5 = vld [vmem:[#allocation7 + $0x48] sm:$0xff]   ;;  %v1211_v7 = vmov 1   ;;  %v1212_v8 = vmov 5   ;;  %v1050_v9 = vld [vmem:[#allocation7 + $0x50] sm:$0xff]   ;;  %v1213_v12 = vmov 6  }
  0x38   :  { %59 = vperm.xlu1 %1032, %v1289_v2   ;;  %81 = vperm.xlu0 %1030, %v1289_v2   ;;  %v1049_v6 = vld [vmem:[#allocation7 + $0x8] sm:$0xff]   ;;  %v1051_v10 = vld [vmem:[#allocation7 + $0x10] sm:$0xff]   ;;  %v1052_v11 = vld [vmem:[#allocation7 + $0x58] sm:$0xff]   ;;  %v1214_v13 = vmov 2   ;;  %v1215_v16 = vmov 7   ;;  %v1216_v17 = vmov 13  }
  0x39   :  { %919 = vmatprep.subr.bf16.mxu0 %v1046_v3  ;;  %v1053_v14 = vld [vmem:[#allocation7 + $0x18] sm:$0xff]   ;;  %v1054_v15 = vld [vmem:[#allocation7 + $0x60] sm:$0xff]   ;;  %v1056_v21 = vld [vmem:[#allocation7 + $0x68] sm:$0xff]   ;;  %v1217_v23 = vmov 12   ;;  %v1218_v24 = vmov 9   ;;  %v1219_v30 = vmov 3  }
  0x3a   :  { %920 = vmatpush3.bf16.msra.mxu0 %v1047_v4  ;;  %v1057_v18 = vld [vmem:[#allocation7 + $0xc0] sm:$0xff]   ;;  %v1061_v22 = vld [vmem:[#allocation7 + $0xc8] sm:$0xff]   ;;  %v1060_v27 = vld [vmem:[#allocation7 + $0x70] sm:$0xff]   ;;  %v1220_v31 = vmov 15   ;;  %v1221_v36 = vmov 8   ;;  %v1222_v41 = vmov 14  }
  0x3b   :  { %921 = vmatprep.subr.bf16.mxu0 %v1048_v5  ;;  %v1059_v19 = vld [vmem:[#allocation7 + $0x80] sm:$0xff]   ;;  %941 = vmatprep.subr.bf16.mxu1 %v1057_v18  ;;  %v1063_v25 = vld [vmem:[#allocation7 + $0x88] sm:$0xff]   ;;  %v1065_v28 = vld [vmem:[#allocation7 + $0xd0] sm:$0xff]   ;;  %v1223_v45 = vmov 10   ;;  %v1224_v49 = vmov 11   ;;  %v1307_v55 = vand.u32 127, %v56_v53 }
  0x3c   :  { %1033 = vset.pattern.permute.xlu1 %v1211_v7  ;;  %1031 = vset.pattern.permute.xlu0 %v1212_v8  ;;  %v1055_v20 = vld [vmem:[#allocation7 + $0x20] sm:$0xff]   ;;  %v1058_v26 = vld [vmem:[#allocation7 + $0x28] sm:$0xff]   ;;  %v1067_v29 = vld [vmem:[#allocation7 + $0x90] sm:$0xff]   ;;  %v1225_v60 = vmov 1.0|1.0   ;;  %s1226_s2 = smov [#allocation8]  }
  0x3d   :  { %63 = vperm.xlu1 %1033, %v1289_v2   ;;  %85 = vperm.xlu0 %1031, %v1289_v2   ;;  %v1062_v32 = vld [vmem:[#allocation7 + $0x30] sm:$0xff]   ;;  %v1068_v33 = vld [vmem:[#allocation7 + $0xd8] sm:$0xff]   ;;  %v1072_v38 = vld [vmem:[#allocation7 + $0xe0] sm:$0xff]   ;;  %s825_s21 = sshll.u32 %s1226_s2, 4  ;;  %s826_s21 = int_to_ptr.vmem [resolvable:$true] %s825_s21 }
  0x3e   :  { %922 = vmatpush3.bf16.msra.mxu0 %v1049_v6  ;;  %942 = vmatpush3.bf16.msra.mxu1 %v1059_v19  ;;  %v1064_v34 = vld [vmem:[#allocation7 + $0x78] sm:$0xff]   ;;  %v1069_v39 = vld [vmem:[#allocation5 + $0x40] sm:$0xff]   ;;  %v1076_v42 = vld [vmem:[#allocation7 + $0xe8] sm:$0xff]   ;;  %s1176_s22 = scalar_lea.vmem %s826_s21, 128  ;;  %p1181_p11 = scmp.lt.s32.totalorder %s826_s21, %s826_s21 }
  0x3f   :  { %923 = vmatprep.subr.bf16.mxu0 %v1050_v9  ;;  %943 = vmatprep.subr.bf16.mxu1 %v1061_v22  ;;  %v1070_v35 = vld [vmem:[#allocation7 + $0x98] sm:$0xff]   ;;  %v1074_v40 = vld [vmem:[#allocation7 + $0xa0] sm:$0xff]   ;;  %v1078_v43 = vld [vmem:[#allocation7 + $0xa8] sm:$0xff]   ;;  %p1177_p10 = scmp.ne.s32.totalorder %s826_s21, %s1176_s22  ;;  %p1182_p12 = scmp.lt.s32.totalorder %s1176_s22, %s1176_s22 }
  0x40   :  { %v1066_v37 = vld [vmem:[#allocation7 + $0x38] sm:$0xff]   ;;  %v1080_v44 = vld [vmem:[#allocation7 + $0xf0] sm:$0xff]   ;;  %v1089_v50 = vld [vmem:[#allocation5 + $0xc0] sm:$0xff]  }
  0x41   :  { %1034 = vset.pattern.permute.xlu1 %v1213_v12  ;;  %1035 = vset.pattern.permute.xlu0 %v1214_v13  ;;  %v1082_v46 = vld [vmem:[#allocation7 + $0xb0] sm:$0xff]   ;;  %v1084_v47 = vld [vmem:[#allocation7 + $0xf8] sm:$0xff]   ;;  %v1071_v1 = vld [vmem:[#allocation5] sm:$0xff]   ;;  %p1183_p13 = por %p1182_p12, %p1181_p11 }
  0x42   :  { %90 = vperm.xlu1 %1034, %v1289_v2   ;;  %68 = vperm.xlu0 %1035, %v1289_v2   ;;  %v1086_v48 = vld [vmem:[#allocation7 + $0xb8] sm:$0xff]   ;;  %v1073_v3 = vld [vmem:[#allocation5 + $0x48] sm:$0xff]   ;;  %v1077_v7 = vld [vmem:[#allocation5 + $0x50] sm:$0xff]  }
  0x43   :  { %924 = vmatpush3.bf16.msra.mxu0 %v1051_v10  ;;  %944 = vmatpush3.bf16.msra.mxu1 %v1063_v25  ;;  %v1075_v6 = vld [vmem:[#allocation5 + $0x8] sm:$0xff]   ;;  %v1079_v9 = vld [vmem:[#allocation5 + $0x10] sm:$0xff]   ;;  %v1083_v13 = vld [vmem:[#allocation5 + $0x18] sm:$0xff]   ;;  %p1184_p0 = pnand %p1183_p13, %p1177_p10 }
  0x44   :  { %925 = vmatprep.subr.bf16.mxu0 %v1052_v11  ;;  %945 = vmatprep.subr.bf16.mxu1 %v1065_v28  ;;  %v1081_v11 = vld [vmem:[#allocation5 + $0x58] sm:$0xff]   ;;  %v1090_v19 = vld [vmem:[#allocation5 + $0x28] sm:$0xff]   ;;  %v1092_v22 = vld [vmem:[#allocation5 + $0x70] sm:$0xff]  }
  0x45   :  { %v1095_v25 = vld [vmem:[#allocation5 + $0x88] sm:$0xff]   ;;  %v1098_v28 = vld [vmem:[#allocation5 + $0x38] sm:$0xff]  }
  0x46   :  { %1036 = vset.pattern.permute.xlu1 %v1215_v16  ;;  %1038 = vset.pattern.permute.xlu0 %v1216_v17  ;;  %v1087_v16 = vld [vmem:[#allocation5 + $0x20] sm:$0xff]   ;;  %v1088_v17 = vld [vmem:[#allocation5 + $0x68] sm:$0xff]  }
  0x47   :  { %95 = vperm.xlu1 %1036, %v1289_v2   ;;  %129 = vperm.xlu0 %1038, %v1289_v2  }
  0x48   :  { %926 = vmatpush3.bf16.msra.mxu0 %v1053_v14  ;;  %946 = vmatpush3.bf16.msra.mxu1 %v1067_v29  ;;  %v1085_v14 = vld [vmem:[#allocation5 + $0x60] sm:$0xff]   ;;  %v1099_v29 = vld [vmem:[#allocation5 + $0x90] sm:$0xff]  }
  0x49   :  { %927 = vmatprep.subr.bf16.mxu0 %v1054_v15  ;;  %947 = vmatprep.subr.bf16.mxu1 %v1068_v33  ;;  %v1103_v33 = vld [vmem:[#allocation5 + $0xa0] sm:$0xff]  }
  0x4b   :  { %1037 = vset.pattern.permute.xlu1 %v1217_v23  ;;  %1041 = vset.pattern.permute.xlu0 %v1218_v24  ;;  %v1093_v23 = vld [vmem:[#allocation5 + $0xc8] sm:$0xff]   ;;  %v1094_v24 = vld [vmem:[#allocation5 + $0x30] sm:$0xff]  }
  0x4c   :  { %125 = vperm.xlu1 %1037, %v1289_v2   ;;  %107 = vperm.xlu0 %1041, %v1289_v2  }
  0x4d   :  { %928 = vmatpush3.bf16.msra.mxu0 %v1055_v20  ;;  %948 = vmatpush3.bf16.msra.mxu1 %v1070_v35  ;;  %v1091_v20 = vld [vmem:[#allocation5 + $0x80] sm:$0xff]   ;;  %v1105_v35 = vld [vmem:[#allocation5 + $0xa8] sm:$0xff]  }
  0x4e   :  { %929 = vmatprep.subr.bf16.mxu0 %v1056_v21  ;;  %949 = vmatprep.subr.bf16.mxu1 %v1072_v38  ;;  %v1108_v38 = vld [vmem:[#allocation5 + $0xf8] sm:$0xff]  }
  0x50   :  { %1039 = vset.pattern.permute.xlu1 %v1219_v30  ;;  %1044 = vset.pattern.permute.xlu0 %v1220_v31  ;;  %v1100_v30 = vld [vmem:[#allocation5 + $0xd8] sm:$0xff]  }
  0x51   :  { %73 = vperm.xlu1 %1039, %v1289_v2   ;;  %139 = vperm.xlu0 %1044, %v1289_v2   ;;  %v1101_v31 = vld [vmem:[#allocation5 + $0x98] sm:$0xff]  }
  0x52   :  { %930 = vmatpush3.bf16.msra.mxu0 %v1058_v26  ;;  %950 = vmatpush3.bf16.msra.mxu1 %v1074_v40  ;;  %v1096_v26 = vld [vmem:[#allocation5 + $0x78] sm:$0xff]  }
  0x53   :  { %931 = vmatprep.subr.bf16.mxu0 %v1060_v27  ;;  %951 = vmatprep.subr.bf16.mxu1 %v1076_v42  ;;  %v1097_v27 = vld [vmem:[#allocation5 + $0xd0] sm:$0xff]  }
  0x55   :  { %1040 = vset.pattern.permute.xlu1 %v1221_v36  ;;  %v1106_v36 = vld [vmem:[#allocation5 + $0xf0] sm:$0xff]  }
  0x56   :  { %103 = vperm.xlu1 %1040, %v1289_v2   ;;  %932 = vmatpush3.bf16.msra.mxu0 %v1062_v32  ;;  %v1102_v32 = vld [vmem:[#allocation5 + $0xe0] sm:$0xff]  }
  0x57   :  { %933 = vmatprep.subr.bf16.mxu0 %v1064_v34  ;;  %952 = vmatpush3.bf16.msra.mxu1 %v1078_v43  ;;  %v1104_v34 = vld [vmem:[#allocation5 + $0xe8] sm:$0xff]  }
  0x58   :  { %953 = vmatprep.subr.bf16.mxu1 %v1080_v44 }
  0x5a   :  { %1042 = vset.pattern.permute.xlu1 %v1222_v41  ;;  %934 = vmatpush3.bf16.msra.mxu0 %v1066_v37  ;;  %v1107_v37 = vld [vmem:[#allocation5 + $0xb0] sm:$0xff]  }
  0x5b   :  { %134 = vperm.xlu1 %1042, %v1289_v2   ;;  %963 = vmatprep.subr.bf16.mxu0 %v1069_v39  ;;  %v1109_v39 = vld [vmem:[#allocation5 + $0xb8] sm:$0xff]  }
  0x5c   :  { %954 = vmatpush3.bf16.msra.mxu1 %v1082_v46 }
  0x5d   :  { %955 = vmatprep.subr.bf16.mxu1 %v1084_v47 }
  0x5f   :  { %1043 = vset.pattern.permute.xlu1 %v1223_v45 }
  0x60   :  { %112 = vperm.xlu1 %1043, %v1289_v2   ;;  %956 = vmatpush3.bf16.msra.mxu1 %v1086_v48 }
  0x61   :  { %985 = vmatprep.subr.bf16.mxu1 %v1089_v50 }
  0x64   :  { %1045 = vset.pattern.permute.xlu1 %v1224_v49 }
  0x65   :  { %117 = vperm.xlu1 %1045, %v1289_v2  }
  0xb7   :  { %v60_v51 = vpop.permute.xlu1 %59  ;;  %v82_v52 = vpop.permute.xlu0 %81 }
  0xb8   :  { %vm83_vm0 = vcmp.eq.s32.totalorder %v82_v52, %v1307_v55  ;;  %vm61_vm10 = vcmp.eq.s32.totalorder %v60_v51, %v1307_v55 }
  0xbc   :  { %v64_v54 = vpop.permute.xlu1 %63  ;;  %v86_v56 = vpop.permute.xlu0 %85 }
  0xbd   :  { %vm87_vm1 = vcmp.eq.s32.totalorder %v86_v56, %v1307_v55  ;;  %vm65_vm8 = vcmp.eq.s32.totalorder %v64_v54, %v1307_v55 }
  0xbe   :  { %vm88_vm2 = vmor %vm83_vm0, %vm87_vm1 }
  0xbf   :  { %vm66_vm11 = vmor %vm61_vm10, %vm65_vm8 }
  0xc1   :  { %v91_v57 = vpop.permute.xlu1 %90  ;;  %v69_v61 = vpop.permute.xlu0 %68 }
  0xc2   :  { %vm92_vm3 = vcmp.eq.s32.totalorder %v91_v57, %v1307_v55  ;;  %vm70_vm9 = vcmp.eq.s32.totalorder %v69_v61, %v1307_v55 }
  0xc3   :  { %vm93_vm4 = vmor %vm88_vm2, %vm92_vm3 }
  0xc4   :  { %vm71_vm12 = vmor %vm66_vm11, %vm70_vm9 }
  0xc6   :  { %v96_v58 = vpop.permute.xlu1 %95  ;;  %v130_v63 = vpop.permute.xlu0 %129 }
  0xc7   :  { %vm97_vm5 = vcmp.eq.s32.totalorder %v96_v58, %v1307_v55  ;;  %vm131_vm1 = vcmp.eq.s32.totalorder %v130_v63, %v1307_v55 }
  0xc8   :  { %vm1313_vm6 = vmor %vm93_vm4, %vm97_vm5 }
  0xc9   :  { %vm871_vm7 = vmpackc.low %vm1313_vm6, %vm1313_vm6 }
  0xca   :  { %872 = vmatprep.mubr.msk.bf16.mxu0 %vm871_vm7, %v1225_v60 }
  0xcb   :  { %v126_v62 = vpop.permute.xlu1 %125  ;;  %v108_v4 = vpop.permute.xlu0 %107 }
  0xcc   :  { %vm127_vm0 = vcmp.eq.s32.totalorder %v126_v62, %v1307_v55  ;;  %vm109_vm9 = vcmp.eq.s32.totalorder %v108_v4, %v1307_v55 }
  0xcd   :  { %vm132_vm3 = vmor %vm127_vm0, %vm131_vm1 }
  0xd0   :  { %v74_v0 = vpop.permute.xlu1 %73  ;;  %v140_v8 = vpop.permute.xlu0 %139 }
  0xd1   :  { %vm75_vm13 = vcmp.eq.s32.totalorder %v74_v0, %v1307_v55  ;;  %vm141_vm2 = vcmp.eq.s32.totalorder %v140_v8, %v1307_v55 }
  0xd2   :  { %vm1330_vm14 = vmor %vm71_vm12, %vm75_vm13 }
  0xd3   :  { %vm873_vm15 = vmpackc.low %vm1330_vm14, %vm1330_vm14 }
  0xd4   :  { %874 = vmatmul.mubr.msk.bf16.vlgmr.msra.gmra.mrb[0].mxu0 %vm873_vm15, %v1225_v60 }
  0xd5   :  { %964 = vmatpush3.bf16.msra.mxu0 %v1071_v1  ;;  %v104_v5 = vpop.permute.xlu1 %103  ;;  %912 = vmatprep.mubr.msk.bf16.mxu0 %vm871_vm7, %v1225_v60 }
  0xd6   :  { %965 = vmatprep.subr.bf16.mxu0 %v1073_v3  ;;  %vm105_vm8 = vcmp.eq.s32.totalorder %v104_v5, %v1307_v55 }
  0xd7   :  { %vm110_vm11 = vmor %vm105_vm8, %vm109_vm9 }
  0xd9   :  { %966 = vmatpush3.bf16.msra.mxu0 %v1075_v6 }
  0xda   :  { %v135_v10 = vpop.permute.xlu1 %134  ;;  %967 = vmatprep.subr.bf16.mxu0 %v1077_v7 }
  0xdb   :  { %vm136_vm4 = vcmp.eq.s32.totalorder %v135_v10, %v1307_v55 }
  0xdc   :  { %vm137_vm5 = vmor %vm132_vm3, %vm136_vm4 }
  0xdd   :  { %968 = vmatpush3.bf16.msra.mxu0 %v1079_v9  ;;  %vm1353_vm6 = vmor %vm137_vm5, %vm141_vm2 }
  0xde   :  { %vm875_vm7 = vmpackc.low %vm1353_vm6, %vm1353_vm6  ;;  %969 = vmatprep.subr.bf16.mxu0 %v1081_v11 }
  0xdf   :  { %v113_v15 = vpop.permute.xlu1 %112  ;;  %876 = vmatprep.mubr.msk.bf16.mxu1 %vm875_vm7, %v1225_v60 }
  0xe0   :  { %vm114_vm10 = vcmp.eq.s32.totalorder %v113_v15, %v1307_v55 }
  0xe1   :  { %970 = vmatpush3.bf16.msra.mxu0 %v1083_v13  ;;  %vm115_vm12 = vmor %vm110_vm11, %vm114_vm10 }
  0xe2   :  { %971 = vmatprep.subr.bf16.mxu0 %v1085_v14 }
  0xe4   :  { %v118_v18 = vpop.permute.xlu1 %117 }
  0xe5   :  { %vm119_vm13 = vcmp.eq.s32.totalorder %v118_v18, %v1307_v55  ;;  %972 = vmatpush3.bf16.msra.mxu0 %v1087_v16 }
  0xe6   :  { %vm1370_vm0 = vmor %vm115_vm12, %vm119_vm13  ;;  %973 = vmatprep.subr.bf16.mxu0 %v1088_v17 }
  0xe7   :  { %vm877_vm1 = vmpackc.low %vm1370_vm0, %vm1370_vm0 }
  0xe8   :  { %878 = vmatmul.mubr.msk.bf16.vlgmr.msra.gmra.mrb[0].mxu1 %vm877_vm1, %v1225_v60 }
  0xe9   :  { %974 = vmatpush3.bf16.msra.mxu0 %v1090_v19  ;;  %986 = vmatpush3.bf16.msra.mxu1 %v1091_v20 }
  0xea   :  { %916 = vmatprep.mubr.msk.bf16.mxu1 %vm875_vm7, %v1225_v60  ;;  %975 = vmatprep.subr.bf16.mxu0 %v1092_v22 }
  0xeb   :  { %987 = vmatprep.subr.bf16.mxu1 %v1093_v23 }
  0xed   :  { %976 = vmatpush3.bf16.msra.mxu0 %v1094_v24  ;;  %988 = vmatpush3.bf16.msra.mxu1 %v1095_v25 }
  0xee   :  { %977 = vmatprep.subr.bf16.mxu0 %v1096_v26  ;;  %989 = vmatprep.subr.bf16.mxu1 %v1097_v27 }
  0xf1   :  { %978 = vmatpush3.bf16.msra.mxu0 %v1098_v28  ;;  %990 = vmatpush3.bf16.msra.mxu1 %v1099_v29 }
  0xf2   :  { %991 = vmatprep.subr.bf16.mxu1 %v1100_v30 }
  0xf4   :  { %914 = vmatmul.mubr.msk.bf16.vlgmr.msra.gmra.mrb[4].mxu0 %vm873_vm15, %v1225_v60 }
  0xf5   :  { %992 = vmatpush3.bf16.msra.mxu1 %v1101_v31 }
  0xf6   :  { %993 = vmatprep.subr.bf16.mxu1 %v1102_v32 }
  0xf9   :  { %994 = vmatpush3.bf16.msra.mxu1 %v1103_v33 }
  0xfa   :  { %995 = vmatprep.subr.bf16.mxu1 %v1104_v34 }
  0xfd   :  { %996 = vmatpush3.bf16.msra.mxu1 %v1105_v35 }
  0xfe   :  { %997 = vmatprep.subr.bf16.mxu1 %v1106_v36 }
 0x101   :  { %998 = vmatpush3.bf16.msra.mxu1 %v1107_v37 }
 0x102   :  { %999 = vmatprep.subr.bf16.mxu1 %v1108_v38 }
 0x105   :  { %1000 = vmatpush3.bf16.msra.mxu1 %v1109_v39 }
 0x108   :  { %918 = vmatmul.mubr.msk.bf16.vlgmr.msra.gmra.mrb[4].mxu1 %vm877_vm1, %v1225_v60 }
 0x1a7   :  { %v935_v40 = vpop.f32.mrb[0].mxu0 }
 0x1a8   :  { %v936_v41 = vpop.f32.mrb[1].mxu0 }
 0x1a9   :  { %v937_v42 = vadd.f32 %v936_v41, %v935_v40  ;;  %v938_v43 = vpop.f32.mrb[2].mxu0 }
 0x1aa   :  { %v939_v44 = vpop.f32.mrb[3].mxu0 }
 0x1bb   :  { %v957_v45 = vpop.f32.mrb[0].mxu1 }
 0x1bc   :  { %v958_v46 = vpop.f32.mrb[1].mxu1 }
 0x1bd   :  { %v959_v47 = vadd.f32 %v958_v46, %v957_v45  ;;  %v960_v48 = vpop.f32.mrb[2].mxu1 }
 0x1be   :  { %v961_v49 = vpop.f32.mrb[3].mxu1 }
 0x1bf   :  { %v541_v50 = vadd.f32 %v959_v47, %v937_v42 }
 0x1c7   :  { %v979_v51 = vpop.f32.mrb[4].mxu0 }
 0x1c8   :  { %v980_v52 = vpop.f32.mrb[5].mxu0 }
 0x1c9   :  { %v981_v53 = vadd.f32 %v980_v52, %v979_v51  ;;  %v982_v54 = vpop.f32.mrb[6].mxu0 }
 0x1ca   :  { %v983_v55 = vpop.f32.mrb[7].mxu0 }
 0x1cb   :  { %v773_v56 = vadd.f32 %v981_v53, %v541_v50 }
 0x1db   :  { %v1001_v57 = vpop.f32.mrb[4].mxu1 }
 0x1dc   :  { %v1002_v58 = vpop.f32.mrb[5].mxu1 }
 0x1dd   :  { %v1003_v59 = vadd.f32 %v1002_v58, %v1001_v57  ;;  %v1004_v60 = vpop.f32.mrb[6].mxu1 }
 0x1de   :  { %v1005_v61 = vpop.f32.mrb[7].mxu1 }
 0x1df   :  { %v813_v62 = vadd.f32 %v1003_v59, %v773_v56 }
 0x1e1   :  { %818 = vst [vmem:[#allocation8] sm:$0xff] %v813_v62 }
 0x1e2   :  { %1187 = shalt.err (!%p1184_p0)
}
 0x1e3   :  { %s1188_s25 = scalar_lea.hbm %s1416_s3, 128 }
 0x1e4   :  { %p1189_p1 = scmp.ne.s32.totalorder %s1416_s3, %s1188_s25  ;;  %p1192_p2 = scmp.lt.u32.totalorder %s1188_s25, %s1416_s3 }
 0x1e6   :  { %p1194_p3 = pnand %p1192_p2, %p1189_p1 }
 0x1e8   :  { %1197 = shalt.err (!%p1194_p3)
}
 0x1e9   :  { %828 = dma.vmem_to_hbm [thread:$0]  %s826_s21, 128, %s1416_s3, [#allocation4]  }
 0x1ea   :  { %1202 = dma.done.wait [#allocation4], 128  }
 0x1eb   :  { %1203 = vsyncadd [#allocation4], 4294967168 }
 0x1ec   :  { %832 = vsyncpa [#allocation3], 1 }
 0x1ed   :  { %833 = vsyncpa [#allocation6], 1 }
 0x1ee   :  { %834 = vsyncpa [#allocation4], 1 }

</bundles_post_ra>
